<compile_context>
chip_gen: v5e
topology: v5e:2x2
jax: 0.10.0
libtpu: 0.0.40
codegen_flags: <defaults>
</compile_context>

<pallas_src>
import math
from functools import partial

import jax
import jax.numpy as jnp
from jax.experimental import pallas as pl
from jax.experimental.pallas import tpu as pltpu


def _round_up(a, b):
    return ((a + b - 1) // b) * b


def _label_smoothing_kernel(x_ref, tgt_ref, out_ref, *, tile_v, padding_idx,
                            confidence, smooth_val, num_cols, ragged_v):
    """Grid = (row_blocks, vocab_blocks); vocab axis last + accumulated.

    out_ref is a lane-dense (tile_n, 128) resident accumulator holding, per row,
    128 partial sums of  sum_c t[r,c] * x[r,c]  (the cross-entropy part of the
    KL divergence).  The entropy constant and the final reduction are applied
    outside the kernel.
    """
    j = pl.program_id(1)

    tgt = tgt_ref[...]                              # (tn, 1) int32
    valid_row = tgt != padding_idx                  # (tn, 1) bool

    @pl.when(j == 0)
    def _():
        out_ref[...] = jnp.zeros_like(out_ref)

    x = x_ref[...].astype(jnp.float32)              # (tn, tv)
    tn, tv = x.shape

    # Global column index for this vocab tile, built from a (1, tile_v) iota
    # (no full-tile int32 iota materialized).
    col = jax.lax.broadcasted_iota(jnp.int32, (1, tv), 1) + j * tile_v

    # Columns that must contribute exactly zero: the padding column and (only
    # when V is not a tile_v multiple) out-of-bounds columns of the ragged edge
    # block (those lanes hold arbitrary bits since x is streamed unpadded).
    # Use a SELECT on x, not a 0-weight multiply, so -inf/NaN never propagates.
    col_keep = col != padding_idx                   # (1, tv)
    if ragged_v:
        col_keep = jnp.logical_and(col_keep, col < num_cols)
    x_keep = jnp.where(col_keep, x, jnp.float32(0.0))

    # Smoothed-target weights: confidence at the target column, smooth_val
    # elsewhere (padding / OOB columns already zeroed via x_keep).
    w = jnp.where(col == tgt, jnp.float32(confidence), jnp.float32(smooth_val))
    contrib = w * x_keep                            # (tn, tv)

    # Lane-dense partial: 128-wide chunk accumulation on the VPU; the single
    # cross-lane reduce is paid once, outside the kernel.
    part = contrib[:, 0:128]
    for k in range(1, tv // 128):
        part = part + contrib[:, k * 128:(k + 1) * 128]

    # Row-validity mask applied to the (tn, 128) partial (select, so garbage in
    # padded / padding-target rows contributes exactly 0).
    out_ref[...] += jnp.where(valid_row, part, jnp.float32(0.0))


def label_smoothing_loss(x, target, *, size, padding_idx, smoothing,
                         tile_n=256, tile_v=4096):
    """x: (N, size) log-probs (f32 or bf16), target: (N,) int -> scalar f32 loss.

    Matches PyTorch LabelSmoothing + nn.KLDivLoss(reduction='sum').
    """
    N, V = x.shape
    assert V == size
    assert size > 2, "label smoothing requires size > 2"

    confidence = 1.0 - smoothing
    smooth_val = smoothing / (size - 2)
    # Entropy of the smoothed distribution for one valid row (t<=0 entries -> 0).
    h_const = 0.0
    if confidence > 0.0:
        h_const += confidence * math.log(confidence)
    if smooth_val > 0.0:
        h_const += (size - 2) * smooth_val * math.log(smooth_val)

    # Vocab tile: lane axis multiple of 128, capped at the (padded) vocab width.
    tile_v = _round_up(min(tile_v, _round_up(V, 128)), 128)
    # Row tile: multiple of 8; keep >= 2 row blocks when N allows so the
    # "parallel" axis can be sharded across v7x's two TensorCores.
    tile_n = max(8, min(tile_n, _round_up(-(-N // 2), 8)))

    nb = pl.cdiv(N, tile_n)
    vb = pl.cdiv(V, tile_v)
    n_rows = nb * tile_n
    ragged_v = (V % tile_v) != 0

    # Only the tiny target vector gets padded (padding_idx rows contribute 0);
    # the big x matrix is streamed unpadded and masked in-kernel.
    tgt = target.astype(jnp.int32).reshape(-1, 1)
    if n_rows != N:
        tgt = jnp.pad(tgt, ((0, n_rows - N), (0, 0)),
                      constant_values=padding_idx)

    kernel = partial(_label_smoothing_kernel,
                     tile_v=tile_v, padding_idx=padding_idx,
                     confidence=confidence, smooth_val=smooth_val,
                     num_cols=V, ragged_v=ragged_v)

    x_block_bytes = tile_n * tile_v * x.dtype.itemsize
    vmem_limit = int(min(100 * 1024 * 1024,
                         max(16 * 1024 * 1024, 3 * x_block_bytes + (4 << 20))))

    cost = pl.CostEstimate(
        flops=int(6 * N * _round_up(V, 128)),
        transcendentals=0,
        bytes_accessed=int(x.size * x.dtype.itemsize + tgt.size * 4
                           + n_rows * 128 * 4),
    )

    partials = pl.pallas_call(
        kernel,
        out_shape=jax.ShapeDtypeStruct((n_rows, 128), jnp.float32),
        grid=(nb, vb),
        in_specs=[
            pl.BlockSpec((tile_n, tile_v), lambda i, j: (i, j)),
            pl.BlockSpec((tile_n, 1), lambda i, j: (i, 0)),
        ],
        # Same block index across the vocab axis -> resident lane-dense
        # accumulator; one (tile_n, 128) writeback per row block.
        out_specs=pl.BlockSpec((tile_n, 128), lambda i, j: (i, 0)),
        compiler_params=pltpu.CompilerParams(
            dimension_semantics=("parallel", "arbitrary"),
            vmem_limit_bytes=vmem_limit),
        cost_estimate=cost,
    )(x, tgt)

    # loss = sum_valid_rows [ h_const - sum_c t*x ]
    n_valid = jnp.sum((target != padding_idx).astype(jnp.float32))
    return n_valid * jnp.float32(h_const) - jnp.sum(partials)


def _reference_loss(x, target, *, size, padding_idx, smoothing):
    """Pure-JAX reference matching PyTorch LabelSmoothing + KLDivLoss(sum)."""
    N = x.shape[0]
    conf = 1.0 - smoothing
    sv = smoothing / (size - 2)
    true_dist = jnp.full((N, size), sv, dtype=jnp.float32)
    true_dist = true_dist.at[jnp.arange(N), target].set(conf)
    true_dist = true_dist.at[:, padding_idx].set(0.0)
    true_dist = jnp.where((target == padding_idx)[:, None], 0.0, true_dist)
    safe_t = jnp.where(true_dist > 0, true_dist, 1.0)
    return jnp.sum(jnp.where(true_dist > 0,
                             true_dist * (jnp.log(safe_t) - x.astype(jnp.float32)),
                             0.0))


if __name__ == "__main__":
    # Small shapes consistent with the training forward: (batch*seq, vocab).
    # Chosen to exercise ragged row & vocab edge blocks, the padding column and
    # padding-target rows.
    N, SIZE = 24, 200
    PADDING_IDX = 0
    SMOOTHING = 0.1

    key = jax.random.PRNGKey(0)
    kx, kt = jax.random.split(key)
    logits = jax.random.normal(kx, (N, SIZE), dtype=jnp.float32)
    x = jax.nn.log_softmax(logits, axis=-1)            # log-probabilities
    target = jax.random.randint(kt, (N,), 0, SIZE, dtype=jnp.int32)
    # Exercise padded-token rows.
    target = target.at[3].set(PADDING_IDX)
    target = target.at[17].set(PADDING_IDX)

    ref = _reference_loss(x, target, size=SIZE, padding_idx=PADDING_IDX,
                          smoothing=SMOOTHING)

    # 1) Default (large) tiles: single vocab block, ragged edges masked in-kernel.
    loss_default = label_smoothing_loss(
        x, target, size=SIZE, padding_idx=PADDING_IDX, smoothing=SMOOTHING)
    jax.block_until_ready(loss_default)

    # 2) Tiny tiles: multiple row blocks + multiple vocab blocks, exercising the
    #    resident-accumulator path, the ragged last vocab tile and padded rows.
    loss_tiled = label_smoothing_loss(
        x, target, size=SIZE, padding_idx=PADDING_IDX, smoothing=SMOOTHING,
        tile_n=8, tile_v=128)
    jax.block_until_ready(loss_tiled)

    assert jnp.allclose(loss_default, ref, rtol=1e-4, atol=1e-3), (loss_default, ref)
    assert jnp.allclose(loss_tiled, ref, rtol=1e-4, atol=1e-3), (loss_tiled, ref)
    print("KERNEL_OK")
</pallas_src>

<mosaic_0001>
module attributes {stable_mosaic.version = 11 : i64} {
  func.func @_label_smoothing_kernel(%arg0: i32, %arg1: i32, %arg2: memref<16x256xf32, #tpu.memory_space<vmem>>, %arg3: memref<16x1xi32, #tpu.memory_space<vmem>>, %arg4: memref<16x128xf32, #tpu.memory_space<vmem>>) attributes {dimension_semantics = [#tpu.dimension_semantics<parallel>, #tpu.dimension_semantics<arbitrary>], iteration_bounds = array<i64: 2, 1>, scalar_prefetch = 0 : i64, scratch_operands = 0 : i64, tpu.core_type = #tpu.core_type<tc>, window_params = [{transform_indices = @transform_0, window_bounds = array<i64: 16, 256>}, {transform_indices = @transform_1, window_bounds = array<i64: 16, 1>}, {transform_indices = @transform_2, window_bounds = array<i64: 16, 128>}]} {
    %c0 = arith.constant 0 : index
    %c0_0 = arith.constant 0 : index
    %0 = vector.load %arg3[%c0, %c0_0] : memref<16x1xi32, #tpu.memory_space<vmem>>, vector<16x1xi32>
    %c0_i32 = arith.constant 0 : i32
    %1 = vector.broadcast %c0_i32 : i32 to vector<16x1xi32>
    %2 = arith.cmpi ne, %0, %1 : vector<16x1xi32>
    %c0_i32_1 = arith.constant 0 : i32
    %3 = arith.cmpi eq, %arg1, %c0_i32_1 : i32
    %4 = arith.extui %3 : i1 to i32
    %c0_i32_2 = arith.constant 0 : i32
    %5 = arith.cmpi ne, %4, %c0_i32_2 : i32
    scf.if %5 {
      %cst_13 = arith.constant 0.000000e+00 : f32
      %37 = vector.broadcast %cst_13 : f32 to vector<16x128xf32>
      %c0_14 = arith.constant 0 : index
      %c0_15 = arith.constant 0 : index
      %38 = vector.load %arg4[%c0_14, %c0_15] : memref<16x128xf32, #tpu.memory_space<vmem>>, vector<16x128xf32>
      tpu.vector_store %arg4[%c0_14, %c0_15], %37 {strides = array<i32>} : memref<16x128xf32, #tpu.memory_space<vmem>>, vector<16x128xf32>,
    } else {
    }
    %c0_3 = arith.constant 0 : index
    %c0_4 = arith.constant 0 : index
    %6 = vector.load %arg2[%c0_3, %c0_4] : memref<16x256xf32, #tpu.memory_space<vmem>>, vector<16x256xf32>
    %7 = tpu.iota {dimensions = array<i32: 1>} : vector<1x256xi32>
    %c256_i32 = arith.constant 256 : i32
    %8 = arith.muli %arg1, %c256_i32 : i32
    %9 = vector.broadcast %8 : i32 to vector<1x256xi32>
    %10 = arith.addi %7, %9 : vector<1x256xi32>
    %c0_i32_5 = arith.constant 0 : i32
    %11 = vector.broadcast %c0_i32_5 : i32 to vector<1x256xi32>
    %12 = arith.cmpi ne, %10, %11 : vector<1x256xi32>
    %c200_i32 = arith.constant 200 : i32
    %13 = vector.broadcast %c200_i32 : i32 to vector<1x256xi32>
    %14 = arith.cmpi slt, %10, %13 : vector<1x256xi32>
    %15 = arith.andi %12, %14 : vector<1x256xi1>
    %cst = arith.constant 0.000000e+00 : f32
    %16 = vector.shape_cast %15 : vector<1x256xi1> to vector<1x256xi1>
    %17 = vector.broadcast %16 : vector<1x256xi1> to vector<16x256xi1>
    %18 = vector.broadcast %cst : f32 to vector<16x256xf32>
    %19 = arith.select %17, %6, %18 : vector<16x256xi1>, vector<16x256xf32>
    %20 = vector.broadcast %10 : vector<1x256xi32> to vector<16x256xi32>
    %21 = vector.broadcast %0 : vector<16x1xi32> to vector<16x256xi32>
    %22 = arith.cmpi eq, %20, %21 : vector<16x256xi32>
    %cst_6 = arith.constant 0.899999976 : f32
    %cst_7 = arith.constant 5.05050528E-4 : f32
    %23 = vector.broadcast %cst_6 : f32 to vector<16x256xf32>
    %24 = vector.broadcast %cst_7 : f32 to vector<16x256xf32>
    %25 = arith.select %22, %23, %24 : vector<16x256xi1>, vector<16x256xf32>
    %26 = arith.mulf %25, %19 : vector<16x256xf32>
    %27 = vector.extract_strided_slice %26 {offsets = [0, 0], sizes = [16, 128], strides = [1, 1]} : vector<16x256xf32> to vector<16x128xf32>
    %28 = vector.extract_strided_slice %26 {offsets = [0, 128], sizes = [16, 128], strides = [1, 1]} : vector<16x256xf32> to vector<16x128xf32>
    %29 = arith.addf %27, %28 : vector<16x128xf32>
    %c0_8 = arith.constant 0 : index
    %c0_9 = arith.constant 0 : index
    %30 = vector.load %arg4[%c0_8, %c0_9] : memref<16x128xf32, #tpu.memory_space<vmem>>, vector<16x128xf32>
    %cst_10 = arith.constant 0.000000e+00 : f32
    %31 = vector.shape_cast %2 : vector<16x1xi1> to vector<16x1xi1>
    %32 = vector.broadcast %31 : vector<16x1xi1> to vector<16x128xi1>
    %33 = vector.broadcast %cst_10 : f32 to vector<16x128xf32>
    %34 = arith.select %32, %29, %33 : vector<16x128xi1>, vector<16x128xf32>
    %35 = arith.addf %30, %34 : vector<16x128xf32>
    %c0_11 = arith.constant 0 : index
    %c0_12 = arith.constant 0 : index
    %36 = vector.load %arg4[%c0_11, %c0_12] : memref<16x128xf32, #tpu.memory_space<vmem>>, vector<16x128xf32>
    tpu.vector_store %arg4[%c0_11, %c0_12], %35 {strides = array<i32>} : memref<16x128xf32, #tpu.memory_space<vmem>>, vector<16x128xf32>,
    return
  }
  func.func @transform_0(%arg0: i32, %arg1: i32) -> (i32, i32) {
    %c0_i32 = arith.constant 0 : i32
    return %arg0, %arg1 : i32, i32
  }
  func.func @transform_1(%arg0: i32, %arg1: i32) -> (i32, i32) {
    %c0_i32 = arith.constant 0 : i32
    %c0_i32_0 = arith.constant 0 : i32
    return %arg0, %c0_i32 : i32, i32
  }
  func.func @transform_2(%arg0: i32, %arg1: i32) -> (i32, i32) {
    %c0_i32 = arith.constant 0 : i32
    %c0_i32_0 = arith.constant 0 : i32
    return %arg0, %c0_i32 : i32, i32
  }
}

</mosaic_0001>

<bundles_post_ra>
// kernel: tpu_custom_call.1
= control target key start
LH: loop header
LB: loop body
LE: loop exit
PB: predicated region body
PF: predicated region fallthrough
CT: control target
= control target key end

     0   :  { %7 = vsyncpa [#allocation3], 0  ;;  %s808_s0 = inlined_call_operand.hbm [shape: f32[24,200], index: 0, kind: input, shape index: {}]   ;;  %s809_s1 = inlined_call_operand.vmem [shape: s32[32,1], index: 1, kind: input, shape index: {}]   ;;  %s810_s2 = inlined_call_operand.hbm [shape: f32[32,128], index: 2, kind: output, shape index: {}]  }
   0x1   :  { %9 = vsyncpa [#allocation3 + $0x1], 0 }
   0x2   :  { %10 = vsyncpa [#allocation4], 0 }
   0x3   :  { %12 = vsyncpa [#allocation4 + $0x1], 0  ;;  %s641_s9 = smov 0   ;;  %s643_s10 = smov 0  }
   0x4   :  { %s645_s11 = smov 0   ;;  %s647_s12 = smov 0  }
   0x5   :  { %s649_s13 = smov 0   ;;  %s651_s14 = smov 0  }
   0x6 LB: > { %s404_s15 = sadd.s32 4294967295, %s617_s14   ;;  %s405_s16 = sadd.s32 4294967294, %s617_s14   ;;  %s617_s14 = sphi %s651_s14, %s18_s14   ;;  %s613_s13 = sphi %s649_s13, %s819_s13   ;;  %s609_s12 = sphi %s647_s12, %s818_s12   ;;  %s605_s11 = sphi %s645_s11, %s817_s11   ;;  %s601_s10 = sphi %s643_s10, %s816_s10   ;;  %s597_s9 = sphi %s641_s9, %s815_s9  }
   0x7   : > { %s30_s17 = sadd.s32 1, %s613_s13  ;;  %s39_s18 = sadd.s32 1, %s605_s11 }
   0x8   : > { %p32_p0 = scmp.ge.s32.totalorder %s30_s17, 2  ;;  %p46_p1 = scmp.ne.s32.totalorder %s605_s11, %s601_s10 }
   0x9   : > { %p47_p2 = scmp.eq.s32.totalorder %s617_s14, 0  ;;  %p52_p3 = scmp.ne.s32.totalorder %s601_s10, %s597_s9 }
   0xa   : > { %s821_s17 = smov (%p32_p0, %s30_s17), 0  ;;  %p53_p5 = scmp.eq.s32.totalorder %s404_s15, 0 }
   0xb   : > { %p48_p4 = por %p47_p2, %p46_p1  ;;  %s34_s19 = ssub.s32 %s613_s13, %s821_s17 }
   0xc   : > { %p102_p6 = scmp.eq.s32.totalorder %s404_s15, 1  ;;  %p37_p7 = scmp.eq.s32.totalorder %s34_s19, 0 }
   0xd   : > { %p684_p8 = por %p53_p5, %p52_p3  ;;  %p108_p10 = scmp.eq.s32.totalorder %s405_s16, 1 }
   0xe   : > { %p688_p9 = por %p102_p6, %p46_p1  ;;  %p407_p12 = scmp.ge.s32.totalorder %s617_s14, 2 }
   0xf   : > { %s693_s22 = scalar_select %p37_p7, %s605_s11, %s39_s18  }
  0x10   : > { %p695_p11 = por %p108_p10, %p52_p3  ;;  %124 = sbr.rel (%p407_p12) target bundleno = 57 (0x39), region = 16 }
  0x15   : > { %127 = sbr.rel (!%p48_p4) target bundleno = 57 (0x39), region = 20  ;;  %s128_s24 = sand.u32 (%p48_p4), 1, %s605_s11  }
  0x16   : > { %s409_s25 = sshll.u32 (%p48_p4), %s613_s13, 1  ;;  %s408_s26 = sshll.u32 (%p48_p4), %s128_s24, 5 }
  0x17   : > { %s135_s27 = ssub.s32 (%p48_p4), 3, %s409_s25  ;;  %s707_s3 = scalar_lea.sflag (%p48_p4), [#allocation3], %s128_s24 }
  0x18   : > { %p136_p13 = scmp.lt.s32.totalorder (%p48_p4), %s135_s27, 2  ;;  %s132_s4 = scalar_lea.vmem (%p48_p4), [#allocation2], %s408_s26 }
  0x1a   : > { %s823_s27 = smov (!%p136_p13, %s135_s27), 2 }
  0x1b   : > { %s427_s28 = sshll.u32 %s823_s27, 4 }
  0x1c   : > { %s140_s29 = ssub.s32 32, %s427_s28 }
  0x1d   : > { %s141_s30 = sshll.u32 %s140_s29, 4 }
  0x1e   : > { %142 = vsyncadd %s707_s3, %s141_s30  ;;  %p710_p0 = scmp.ne.s32.totalorder %s427_s28, 0  ;;  %s429_s6 = sshll.u32 %s613_s13, 5 }
  0x1f   : > { %s147_s15 = scalar_lea.hbm %s808_s0, %s429_s6  ;;  %s718_s16 = sshll.u32 %s132_s4, 4  ;;  %s152_s16 = int_to_ptr.vmem [resolvable:$true] %s718_s16 }
  0x20   : > { %s149_s18 = sshll.u32 %s147_s15, 4  ;;  %s416_s19 = sshll.u32 %s823_s27, 8  ;;  %s721_s18 = int_to_ptr.hbm [resolvable:$true] %s149_s18 }
  0x21   : > { %s496_s24 = sshra.s32 %s721_s18, 4  ;;  %s498_s25 = sshrl.u32 %s416_s19, 4  ;;  %s497_s24 = int_to_ptr.hbm [resolvable:$true] %s496_s24 }
  0x22   : > { %s503_s26 = scalar_lea.hbm %s497_s24, %s498_s25  ;;  %s507_s30 = scalar_lea.hbm %s808_s0, 48 }
  0x23   : > { %p504_p1 = scmp.ne.s32.totalorder %s497_s24, %s503_s26  ;;  %p509_p4 = scmp.lt.s32.totalorder %s507_s30, %s503_s26 }
  0x25   : > { %p505_p2 = pnand %p504_p1, %p710_p0 }
  0x27   : > { %p506_p3 = pneg %p505_p2 }
  0x29   : > { %p511_p5 = pnand %p509_p4, %p506_p3 }
  0x2b   : > { %514 = shalt.err (!%p511_p5)
}
  0x2c   : > { %s515_s4 = sshra.s32 %s152_s16, 4  ;;  %s619_s7 = smov [#allocation2]   ;;  %s516_s4 = int_to_ptr.vmem [resolvable:$true] %s515_s4 }
  0x2d   : > { %s522_s6 = scalar_lea.vmem %s516_s4, %s498_s25  ;;  %s526_s8 = scalar_lea.vmem %s619_s7, 64 }
  0x2e   : > { %p523_p6 = scmp.ne.s32.totalorder %s516_s4, %s522_s6  ;;  %p528_p13 = scmp.lt.s32.totalorder %s526_s8, %s522_s6 }
  0x30   : > { %p524_p7 = pnand %p523_p6, %p710_p0 }
  0x32   : > { %p525_p10 = pneg %p524_p7 }
  0x34   : > { %p530_p1 = pnand %p528_p13, %p525_p10 }
  0x36   : > { %533 = shalt.err (!%p530_p1)
}
  0x37   : > { %s620_s15 = smov 256   ;;  %s621_s24 = smov 16  }
  0x38   : > { %157 = dma.hbm_to_vmem [thread:$0]  (%p710_p0), %s721_s18, %s416_s19, %s152_s16, %s707_s3, %s620_s15, %s620_s15, %s621_s24  }
  0x39 PF: > { %p417_p2 = scmp.ge.s32.totalorder %s617_s14, 1  ;;  %p168_p3 = scmp.lt.s32.totalorder %s617_s14, 3 }
  0x3b   : > { %p169_p4 = pnand %p417_p2, %p168_p3 }
  0x3c   : > { %s747_s25 = sand.u32 (!%p169_p4), 1, %s601_s10  }
  0x3d   : > { %172 = sbr.rel (%p169_p4) target bundleno = 208 (0xd0), region = 28  ;;  %s418_s26 = sshll.u32 (!%p169_p4), %s747_s25, 5 }
  0x3e   : > { %s175_s28 = scalar_lea.sflag (!%p169_p4), [#allocation3], %s747_s25  ;;  %s751_s5 = scalar_lea.vmem (!%p169_p4), [#allocation2], %s418_s26 }
  0x42   : > { %588 = dma.done.wait (%p684_p8), %s175_s28, 512  }
  0x43   : > { %590 = vsyncadd (%p684_p8), %s175_s28, 4294966784  ;;  %s420_s27 = sshll.u32 %s609_s12, 1  ;;  %v622_v0 = vmov 0   ;;  %v233_v5 = vlaneseq  ;;  %v229_v8 = vld [vmem:[%s751_s5] sm:$0xff]  ;;  %v230_v9 = vld [vmem:[%s751_s5 + $0x8] sm:$0xff]  ;;  %s419_s20 = sshll.u32 %s747_s25, 4 }
  0x44   : > { %494 = vset.pattern.permute.xlu0 %v622_v0  ;;  %p213_p0 = scmp.lt.s32.totalorder %s420_s27, 3  ;;  %495 = vset.pattern.permute.xlu1 %v622_v0  ;;  %v623_v13 = vmov 0.0005050505   ;;  %v231_v20 = vld [vmem:[%s751_s5 + $0x10] sm:$0xff]  ;;  %v232_v21 = vld [vmem:[%s751_s5 + $0x18] sm:$0xff]  ;;  %s430_s29 = sshll.u32 %s609_s12, 4 }
  0x45   : > { %v234_v6 = vand.u32 127, %v233_v5  ;;  %s304_s6 = scalar_lea.hbm %s810_s2, %s430_s29  ;;  %s204_s7 = scalar_lea.vmem [#allocation5], %s419_s20 }
  0x46   : > { %s825_s27 = smov (!%p213_p0, %s420_s27), 3  ;;  %s305_s12 = sshll.u32 %s204_s7, 4  ;;  %s306_s12 = int_to_ptr.vmem [resolvable:$true] %s305_s12 }
  0x47   : > { %s421_s3 = sshll.u32 %s825_s27, 3  ;;  %v235_v7 = vadd.s32 128, %v234_v6  ;;  %vm240_vm2 = vcmp.ne.s32.totalorder %v234_v6, 0  ;;  %s307_s8 = sshll.u32 %s304_s6, 4  ;;  %s308_s8 = int_to_ptr.hbm [resolvable:$true] %s307_s8 }
  0x48   : > { %s216_s19 = scalar_lea.vmem %s809_s1, %s421_s3  ;;  %v250_v10 = vsel %vm240_vm2, %v229_v8, 0.0  ;;  %v252_v23 = vsel %vm240_vm2, %v231_v20, 0.0  ;;  %s293_s15 = scalar_lea.sflag [#allocation4], %s747_s25 }
  0x49   : > { %v219_v1 = vld [vmem:[%s216_s19] sm:$0xff]  ;;  %v220_v3 = vld [vmem:[%s216_s19 + $0x8] sm:$0xff]  ;;  %vm243_vm3 = vcmp.lt.s32.totalorder %v235_v7, 200  ;;  %s549_s24 = sshra.s32 %s308_s8, 4  ;;  %s555_s27 = scalar_lea.hbm %s810_s2, 32  ;;  %s550_s24 = int_to_ptr.hbm [resolvable:$true] %s549_s24 }
  0x4a   : > { %255 = vperm.xlu0 %494, %v219_v1   ;;  %vm221_vm0 = vcmp.ne.s32.totalorder %v219_v1, 0  ;;  %vm222_vm1 = vcmp.ne.s32.totalorder %v220_v3, 0  ;;  %v251_v11 = vsel %vm243_vm3, %v230_v9, 0.0  ;;  %v253_v24 = vsel %vm243_vm3, %v232_v21, 0.0  ;;  %s551_s26 = scalar_lea.hbm %s550_s24, 16  ;;  %p556_p7 = scmp.lt.s32.totalorder %s550_s24, %s810_s2 }
  0x4b   : > { %v276_v2 = vsel %vm221_vm0, 1, %v622_v0  ;;  %v277_v4 = vsel %vm222_vm1, 1, %v622_v0  ;;  %p552_p8 = scmp.ne.s32.totalorder %s550_s24, %s551_s26  ;;  %p557_p10 = scmp.lt.s32.totalorder %s555_s27, %s551_s26 }
  0x4c   : > { %279 = vperm.xlu1 %495, %v276_v2  }
  0x4d   : > { %p553_p5 = pnand %p552_p8, %p688_p9  ;;  %p558_p13 = por %p557_p10, %p556_p7 }
  0x4f   : > { %p554_p6 = pneg %p553_p5 }
  0x51   : > { %p559_p1 = pnand %p558_p13, %p554_p6 }
  0x52   : > { %258 = vperm.xlu0 %494, %v220_v3  }
  0x54   : > { %282 = vperm.xlu1 %495, %v277_v4  }
  0xbc   : > { %v256_v12 = vpop.permute.xlu0 %255 }
  0xbd   : > { %vm260_vm4 = vcmp.eq.s32.totalorder %v234_v6, %v256_v12  ;;  %vm261_vm5 = vcmp.eq.s32.totalorder %v235_v7, %v256_v12 }
  0xbe   : > { %v264_v14 = vsel %vm260_vm4, 0.9, %v623_v13  ;;  %v265_v15 = vsel %vm261_vm5, 0.9, %v623_v13  ;;  %v280_v16 = vpop.permute.xlu1 %279 }
  0xbf   : > { %v268_v17 = vmul.f32 %v264_v14, %v250_v10  ;;  %v269_v18 = vmul.f32 %v265_v15, %v251_v11  ;;  %vm284_vm6 = vcmp.eq.s32.totalorder %v280_v16, 1 }
  0xc1   : > { %v272_v19 = vadd.f32 %v269_v18, %v268_v17 }
  0xc3   : > { %v286_v22 = vsel %vm284_vm6, %v272_v19, 0.0 }
  0xc4   : > { %v259_v25 = vpop.permute.xlu0 %258  ;;  %290 = vst [vmem:[%s204_s7] sm:$0xff] %v286_v22 }
  0xc5   : > { %vm262_vm7 = vcmp.eq.s32.totalorder %v234_v6, %v259_v25  ;;  %vm263_vm8 = vcmp.eq.s32.totalorder %v235_v7, %v259_v25 }
  0xc6   : > { %v266_v26 = vsel %vm262_vm7, 0.9, %v623_v13  ;;  %v267_v27 = vsel %vm263_vm8, 0.9, %v623_v13  ;;  %v283_v30 = vpop.permute.xlu1 %282 }
  0xc7   : > { %v270_v28 = vmul.f32 %v266_v26, %v252_v23  ;;  %v271_v29 = vmul.f32 %v267_v27, %v253_v24  ;;  %vm285_vm9 = vcmp.eq.s32.totalorder %v283_v30, 1 }
  0xc9   : > { %v273_v31 = vadd.f32 %v271_v29, %v270_v28 }
  0xcb   : > { %v287_v32 = vsel %vm285_vm9, %v273_v31, 0.0 }
  0xcc   : > { %291 = vst [vmem:[%s204_s7 + $0x8] sm:$0xff] %v287_v32 }
  0xcd   : > { %562 = shalt.err (!%p559_p1)
}
  0xce   : > { %s624_s25 = smov 128   ;;  %s625_s18 = smov 8  }
  0xcf   : > { %432 = dma.vmem_to_hbm [thread:$0]  (%p688_p9), %s306_s12, 256, %s308_s8, %s293_s15, %s624_s25, %s624_s25, %s625_s18  }
  0xd0 PF: > { %s322_s19 = sand.u32 1, %s597_s9   ;;  %p435_p2 = pnand %p407_p12, %p695_p11 }
  0xd1   : > { %s323_s20 = scalar_lea.sflag [#allocation4], %s322_s19 }
  0xd2   : > { %p436_p3 = pneg %p435_p2 }
  0xd4   : > { %592 = dma.done.wait (%p436_p3), %s323_s20, 256  }
  0xd5   : > { %594 = vsyncadd (%p436_p3), %s323_s20, 4294967040  ;;  %s18_s14 = sadd.s32 1, %s617_s14   ;;  %s815_s9 = smov %s601_s10 }
  0xd6   : > { %p15_p4 = scmp.ge.s32.totalorder %s18_s14, 4   ;;  %s816_s10 = smov %s605_s11 }
  0xd7   : > { %s817_s11 = smov %s693_s22  ;;  %s818_s12 = smov %s613_s13 }
  0xd8   : > { %s819_s13 = smov %s821_s17  ;;  %17 = sbr.rel (!%p15_p4) target bundleno = 6 (0x6), region = 80 }
  0xdd   :  { %329 = vsyncpa [#allocation3], 1 }
  0xde   :  { %331 = vsyncpa [#allocation3 + $0x1], 1 }
  0xdf   :  { %332 = vsyncpa [#allocation4], 1 }
  0xe0   :  { %334 = vsyncpa [#allocation4 + $0x1], 1 }

</bundles_post_ra>
